<compile_context>
chip_gen: v7x
topology: tpu7x:2x2x1
jax: 0.10.0
libtpu: 0.0.40
codegen_flags: <defaults>
</compile_context>

<pallas_src>
import functools

import jax
import jax.numpy as jnp
from jax import lax
from jax.experimental import pallas as pl
from jax.experimental.pallas import tpu as pltpu


def _round_up(x, m):
    return ((x + m - 1) // m) * m


def _vmem_limit_bytes():
    # Per-generation VMEM budget: ~75% of physical, clamped to [32 MiB, 100 MiB]
    # (v5e/v6e: 128 MiB physical -> ~96 MiB; v7x: 64 MiB physical -> ~48 MiB).
    try:
        cap = int(pltpu.get_tpu_info().vmem_capacity_bytes)
    except Exception:
        cap = 64 * 1024 * 1024
    lim = (cap * 3) // 4
    return int(min(max(lim, 32 * 1024 * 1024), 100 * 1024 * 1024))


# --------------------------------------------------------------------------------------
# Per-tile convolution helper (shared by the stats pass and the output pass).
# --------------------------------------------------------------------------------------
def _conv_tile(x_ref, halo_ref, w_ref, *, k, tile_l, c_in, use_bf16, accum_taps):
    # x_ref:    (1, c_in, tile_l)      -- main activation tile (lane-dense along L)
    # halo_ref: (1, 1, c_in, max(k-1,1)) -- K-1 columns following the tile
    # w_ref:    (tile_co, k*c_in)      -- flattened taps: w[co, t*c_in + c] = weight[co, c, t]
    main = x_ref[0]                                    # (c_in, tile_l)
    w = w_ref[...]                                     # (tile_co, k*c_in)
    if use_bf16:
        main = main.astype(jnp.bfloat16)
        w = w.astype(jnp.bfloat16)

    if k > 1:
        halo = halo_ref[0, 0, :, : k - 1]              # (c_in, k-1)
        if use_bf16:
            halo = halo.astype(jnp.bfloat16)
        window = jnp.concatenate([main, halo], axis=1)  # (c_in, tile_l + k - 1)
    else:
        window = main

    dn = (((1,), (0,)), ((), ()))
    if accum_taps and k > 1:
        # Large C_in: K accumulating MXU matmuls, no materialized (K*C_in, tile_l) patch.
        y = lax.dot_general(w[:, :c_in], main, dn, preferred_element_type=jnp.float32)
        for t in range(1, k):
            y = y + lax.dot_general(
                w[:, t * c_in:(t + 1) * c_in],
                lax.slice(window, (0, t), (c_in, t + tile_l)),
                dn, preferred_element_type=jnp.float32)
        return y

    # Small C_in: fused im2col patch -> one MXU contraction over K*C_in.
    patch = jnp.concatenate(
        [lax.slice(window, (0, t), (c_in, t + tile_l)) for t in range(k)], axis=0)
    return lax.dot_general(w, patch, dn, preferred_element_type=jnp.float32)


# --------------------------------------------------------------------------------------
# Pass 1 (bn=True only): per-tile BN statistics (sum, centered M2).  No y written to HBM.
# --------------------------------------------------------------------------------------
def _conv1d_stats_kernel(x_ref, halo_ref, w_ref, stats_ref, *, k, tile_l, c_in,
                         rem_out, use_bf16, accum_taps):
    y = _conv_tile(x_ref, halo_ref, w_ref, k=k, tile_l=tile_l, c_in=c_in,
                   use_bf16=use_bf16, accum_taps=accum_taps)      # (tile_co, tile_l) f32

    def _write(cnt, mask):
        yv = y if mask is None else jnp.where(mask, y, 0.0)
        s = jnp.sum(yv, axis=1)                                   # (tile_co,)
        m = s * (1.0 / cnt)                                       # per-tile mean
        d = y - m[:, None]
        if mask is not None:
            d = jnp.where(mask, d, 0.0)
        m2 = jnp.sum(d * d, axis=1)                               # centered M2 (stable)
        stats_ref[0, 0, :, :] = jnp.stack([s, m2], axis=0)

    if rem_out == tile_l:
        # No padded output columns anywhere -> no masking on any tile.
        _write(float(tile_l), None)
    else:
        # Mask only on the last L tile; all other tiles take the cheap unmasked path.
        last = pl.program_id(1) == pl.num_programs(1) - 1
        col = lax.broadcasted_iota(jnp.int32, (1, tile_l), 1)

        @pl.when(last)
        def _():
            _write(float(rem_out), col < rem_out)

        @pl.when(jnp.logical_not(last))
        def _():
            _write(float(tile_l), None)


# --------------------------------------------------------------------------------------
# Pass 2: convolution with (possibly BN-folded) weights + bias, optional ReLU, final write.
# --------------------------------------------------------------------------------------
def _conv1d_out_kernel(x_ref, halo_ref, w_ref, b_ref, o_ref, *, k, tile_l, c_in,
                       apply_relu, use_bf16, accum_taps):
    y = _conv_tile(x_ref, halo_ref, w_ref, k=k, tile_l=tile_l, c_in=c_in,
                   use_bf16=use_bf16, accum_taps=accum_taps)      # (tile_co, tile_l) f32
    y = y + b_ref[...]                                            # (tile_co, 1) broadcast
    if apply_relu:
        y = jnp.maximum(y, 0.0)
    o_ref[0, :, :] = y.astype(o_ref.dtype)


# --------------------------------------------------------------------------------------
# Wrapper
# --------------------------------------------------------------------------------------
def conv1d_bn_relu(x_ncl, weight, bias=None, *, relu=True, bn=True, eps=1e-5,
                   use_bf16_matmul=None, accum_taps=None):
    """Forward pass of the PyTorch `Conv1d` module (conv -> [BN] -> [ReLU]).

    Args:
      x_ncl:  (N, C_in, L) float32            -- PyTorch NCL layout.
      weight: (C_out, C_in, K) float32        -- nn.Conv1d weight layout.
      bias:   (C_out,) float32 or None        -- only used when bn=False (module bias=not bn).
      use_bf16_matmul: None -> auto (True iff K*C_in_pad >= 256).  bf16 shifts BN stats
                       slightly vs f32 parity; pass False for exact parity.
      accum_taps: None -> auto (True iff C_in_pad >= 128).
    Returns:
      (N, C_out, L_out) float32, L_out = L - K + 1 (stride 1, no padding).
    """
    n, c_in, l = x_ncl.shape
    c_out, c_in_w, k = weight.shape
    assert c_in == c_in_w
    l_out = l - k + 1
    assert l_out >= 1

    # --- Tiling parameters -----------------------------------------------------------
    c_in_p = _round_up(c_in, 8)            # sublane alignment for the patch rows
    c_out_p = _round_up(c_out, 8)          # sublane alignment for the output tile

    tile_l = min(_round_up(l_out, 128), 1024)       # lane-dense L tiles
    grid_l = pl.cdiv(l_out, tile_l)
    l_out_pad = grid_l * tile_l
    l_in_pad = l_out_pad + k - 1
    rem_out = l_out - (grid_l - 1) * tile_l          # valid output columns in last tile

    tile_co = c_out_p if c_out_p <= 256 else 256     # native MXU N width on v6e/v7x
    grid_co = pl.cdiv(c_out_p, tile_co)

    if use_bf16_matmul is None:
        use_bf16_matmul = (k * c_in_p) >= 256
    if accum_taps is None:
        accum_taps = c_in_p >= 128

    # --- Glue: pad channels/length; build halo side-array; flatten weights ------------
    x = x_ncl.astype(jnp.float32)
    pad_c = c_in_p - c_in
    pad_l = l_in_pad - l
    x_pad = jnp.pad(x, ((0, 0), (0, pad_c), (0, pad_l))) if (pad_c or pad_l) else x

    hw = max(k - 1, 1)
    # halo[j, i, c, t] = x_pad[i, c, (j+1)*tile_l + t] : the K-1 columns after tile j.
    halo_idx = jnp.minimum(
        (jnp.arange(grid_l)[:, None] + 1) * tile_l + jnp.arange(hw)[None, :],
        l_in_pad - 1)
    halo = jnp.transpose(x_pad[:, :, halo_idx], (2, 0, 1, 3))  # (grid_l, n, c_in_p, hw)

    # w_mat[co, t*C_in_p + c] == weight[co, c, t] (matches the kernel's tap/row order).
    w_full = jnp.zeros((c_out_p, c_in_p, k), jnp.float32).at[:c_out, :c_in, :].set(
        weight.astype(jnp.float32))
    w_mat = jnp.transpose(w_full, (0, 2, 1)).reshape(c_out_p, k * c_in_p)

    # --- Grid / specs (shared by both passes) -----------------------------------------
    # Grid order (batch, L, C_out): co innermost so the x/halo blocks are reused (not
    # re-DMAed) across the C_out tiles; weights are the small re-fetched block.
    grid = (n, grid_l, grid_co)
    cparams = pltpu.CompilerParams(
        dimension_semantics=("parallel", "parallel", "parallel"),
        vmem_limit_bytes=_vmem_limit_bytes(),
    )
    x_spec = pl.BlockSpec((1, c_in_p, tile_l), lambda i, j, co: (i, 0, j))
    halo_spec = pl.BlockSpec((1, 1, c_in_p, hw), lambda i, j, co: (j, i, 0, 0))
    w_spec = pl.BlockSpec((tile_co, k * c_in_p), lambda i, j, co: (co, 0))

    # --- Pass 1: BN statistics (no conv output round-trip) ----------------------------
    if bn:
        stats_kernel = functools.partial(
            _conv1d_stats_kernel, k=k, tile_l=tile_l, c_in=c_in_p,
            rem_out=rem_out, use_bf16=use_bf16_matmul, accum_taps=accum_taps)
        stats = pl.pallas_call(
            stats_kernel,
            grid=grid,
            in_specs=[x_spec, halo_spec, w_spec],
            out_specs=pl.BlockSpec((1, 1, 2, tile_co), lambda i, j, co: (i, j, 0, co)),
            out_shape=jax.ShapeDtypeStruct((n, grid_l, 2, c_out_p), jnp.float32),
            compiler_params=cparams,
        )(x_pad, halo, w_mat)

        # Parallel-variance merge of per-tile (sum, centered M2) -> mean/var (biased,
        # training-mode BN with gamma=1, beta=0 per init_bn).
        cnt_j = jnp.full((grid_l,), float(tile_l), jnp.float32).at[grid_l - 1].set(
            float(rem_out))
        total = jnp.float32(n * l_out)
        sums = stats[:, :, 0, :]                                   # (n, grid_l, c_out_p)
        m2s = stats[:, :, 1, :]
        mean = jnp.sum(sums, axis=(0, 1)) / total                  # (c_out_p,)
        tile_means = sums / cnt_j[None, :, None]
        m2 = jnp.sum(m2s, axis=(0, 1)) + jnp.sum(
            cnt_j[None, :, None] * (tile_means - mean[None, None, :]) ** 2, axis=(0, 1))
        var = m2 / total
        inv_std = lax.rsqrt(var + eps)
        # Fold BN into the conv operands for pass 2: w' = w*inv_std, b' = -mean*inv_std.
        w_pass2 = w_mat * inv_std[:, None]
        b_pass2 = (-mean * inv_std).reshape(c_out_p, 1)
    else:
        w_pass2 = w_mat
        b_pass2 = jnp.zeros((c_out_p, 1), jnp.float32)
        if bias is not None:
            b_pass2 = b_pass2.at[:c_out, 0].set(bias.astype(jnp.float32))

    # --- Pass 2: conv (+folded BN bias/scale) + ReLU, write final output --------------
    out_kernel = functools.partial(
        _conv1d_out_kernel, k=k, tile_l=tile_l, c_in=c_in_p,
        apply_relu=relu, use_bf16=use_bf16_matmul, accum_taps=accum_taps)
    out = pl.pallas_call(
        out_kernel,
        grid=grid,
        in_specs=[x_spec, halo_spec, w_spec,
                  pl.BlockSpec((tile_co, 1), lambda i, j, co: (co, 0))],
        out_specs=pl.BlockSpec((1, tile_co, tile_l), lambda i, j, co: (i, co, j)),
        out_shape=jax.ShapeDtypeStruct((n, c_out_p, l_out), jnp.float32),
        compiler_params=cparams,
    )(x_pad, halo, w_pass2, b_pass2)

    if c_out_p != c_out:
        out = out[:, :c_out, :]
    return out


# --------------------------------------------------------------------------------------
# Pure-JAX reference (semantics of the PyTorch module's forward pass).
# --------------------------------------------------------------------------------------
def _reference(x_ncl, weight, bias=None, *, relu=True, bn=True, eps=1e-5):
    y = lax.conv_general_dilated(
        x_ncl, weight, window_strides=(1,), padding="VALID",
        dimension_numbers=("NCH", "OIH", "NCH"),
    )
    if bias is not None and not bn:
        y = y + bias[None, :, None]
    if bn:
        mean = jnp.mean(y, axis=(0, 2), keepdims=True)
        var = jnp.mean((y - mean) ** 2, axis=(0, 2), keepdims=True)
        y = (y - mean) * lax.rsqrt(var + eps)
    if relu:
        y = jnp.maximum(y, 0.0)
    return y


if __name__ == "__main__":
    key = jax.random.PRNGKey(0)
    kx, kw, kb = jax.random.split(key, 3)

    # Small deterministic problem: batch=2, in_channels=4, out_channels=8, length=16, K=3.
    N, C_IN, C_OUT, L, K = 2, 4, 8, 16, 3
    x = jax.random.normal(kx, (N, C_IN, L), dtype=jnp.float32)
    bound = 1.0 / jnp.sqrt(jnp.float32(C_IN * K))   # stand-in for nn.Conv1d default init
    weight = jax.random.uniform(kw, (C_OUT, C_IN, K), jnp.float32, -bound, bound)
    bias = jax.random.uniform(kb, (C_OUT,), jnp.float32, -bound, bound)

    # Default module config: conv (no bias) -> BN (batch stats) -> ReLU.
    out = jax.block_until_ready(conv1d_bn_relu(x, weight, relu=True, bn=True))
    ref = _reference(x, weight, relu=True, bn=True)
    assert out.shape == (N, C_OUT, L - K + 1)
    assert jnp.allclose(out, ref, atol=1e-4, rtol=1e-4), "mismatch vs reference (bn=True)"

    # bn=False config: conv (with bias) -> ReLU.
    out2 = jax.block_until_ready(conv1d_bn_relu(x, weight, bias, relu=True, bn=False))
    ref2 = _reference(x, weight, bias, relu=True, bn=False)
    assert out2.shape == (N, C_OUT, L - K + 1)
    assert jnp.allclose(out2, ref2, atol=1e-4, rtol=1e-4), "mismatch vs reference (bn=False)"

    # Multi-tile case (grid_l > 1): exercises the halo side-array, the masked last tile,
    # the cross-tile variance merge, and the K-accumulating-matmul MXU path.
    L2 = 1500
    x3 = jax.random.normal(kx, (N, C_IN, L2), dtype=jnp.float32)
    out3 = jax.block_until_ready(
        conv1d_bn_relu(x3, weight, relu=True, bn=True, accum_taps=True))
    ref3 = _reference(x3, weight, relu=True, bn=True)
    assert out3.shape == (N, C_OUT, L2 - K + 1)
    assert jnp.allclose(out3, ref3, atol=1e-4, rtol=1e-4), "mismatch vs reference (multi-tile)"

    print("KERNEL_OK")
</pallas_src>

<mosaic_0001>
module attributes {stable_mosaic.version = 11 : i64} {
  func.func @_conv1d_stats_kernel(%arg0: i32, %arg1: i32, %arg2: i32, %arg3: memref<1x8x128xf32, #tpu.memory_space<vmem>>, %arg4: memref<1x1x8x2xf32, #tpu.memory_space<vmem>>, %arg5: memref<8x24xf32, #tpu.memory_space<vmem>>, %arg6: memref<1x1x2x8xf32, #tpu.memory_space<vmem>>) attributes {dimension_semantics = [#tpu.dimension_semantics<parallel>, #tpu.dimension_semantics<parallel>, #tpu.dimension_semantics<parallel>], iteration_bounds = array<i64: 2, 1, 1>, scalar_prefetch = 0 : i64, scratch_operands = 0 : i64, tpu.core_type = #tpu.core_type<tc>, window_params = [{transform_indices = @transform_0, window_bounds = array<i64: 1, 8, 128>}, {transform_indices = @transform_1, window_bounds = array<i64: 1, 1, 8, 2>}, {transform_indices = @transform_2, window_bounds = array<i64: 8, 24>}, {transform_indices = @transform_3, window_bounds = array<i64: 1, 1, 2, 8>}]} {
    %c0 = arith.constant 0 : index
    %c0_0 = arith.constant 0 : index
    %c0_1 = arith.constant 0 : index
    %0 = vector.load %arg3[%c0, %c0_0, %c0_1] : memref<1x8x128xf32, #tpu.memory_space<vmem>>, vector<1x8x128xf32>
    %1 = vector.shape_cast %0 : vector<1x8x128xf32> to vector<8x128xf32>
    %c0_2 = arith.constant 0 : index
    %c0_3 = arith.constant 0 : index
    %2 = vector.load %arg5[%c0_2, %c0_3] : memref<8x24xf32, #tpu.memory_space<vmem>>, vector<8x24xf32>
    %c0_4 = arith.constant 0 : index
    %c0_5 = arith.constant 0 : index
    %c0_6 = arith.constant 0 : index
    %c0_7 = arith.constant 0 : index
    %3 = vector.load %arg4[%c0_4, %c0_5, %c0_6, %c0_7] : memref<1x1x8x2xf32, #tpu.memory_space<vmem>>, vector<1x1x8x2xf32>
    %4 = vector.shape_cast %3 : vector<1x1x8x2xf32> to vector<8x2xf32>
    %5 = tpu.concatenate %1, %4 in 1 : vector<8x128xf32>, vector<8x2xf32> -> vector<8x130xf32>
    %6 = vector.extract_strided_slice %5 {offsets = [0, 0], sizes = [8, 128], strides = [1, 1]} : vector<8x130xf32> to vector<8x128xf32>
    %7 = vector.extract_strided_slice %5 {offsets = [0, 1], sizes = [8, 128], strides = [1, 1]} : vector<8x130xf32> to vector<8x128xf32>
    %8 = vector.extract_strided_slice %5 {offsets = [0, 2], sizes = [8, 128], strides = [1, 1]} : vector<8x130xf32> to vector<8x128xf32>
    %9 = tpu.concatenate %6, %7, %8 in 0 : vector<8x128xf32>, vector<8x128xf32>, vector<8x128xf32> -> vector<24x128xf32>
    %cst = arith.constant dense<0.000000e+00> : vector<8x128xf32>
    %10 = tpu.matmul %2, %9, %cst {dimension_numbers = #tpu.dot_dimension_numbers<[1], [0], [0], [1], [0, 0, 1, 1], [], []>} : vector<8x24xf32>, vector<24x128xf32>, vector<8x128xf32> -> vector<8x128xf32>
    %c0_i32 = arith.constant 0 : i32
    %11 = arith.cmpi eq, %arg1, %c0_i32 : i32
    %12 = tpu.iota {dimensions = array<i32: 1>} : vector<1x128xi32>
    %13 = arith.extui %11 : i1 to i32
    %c0_i32_8 = arith.constant 0 : i32
    %14 = arith.cmpi ne, %13, %c0_i32_8 : i32
    scf.if %14 {
      %c14_i32 = arith.constant 14 : i32
      %18 = vector.broadcast %c14_i32 : i32 to vector<1x128xi32>
      %19 = arith.cmpi slt, %12, %18 : vector<1x128xi32>
      %cst_10 = arith.constant 0.000000e+00 : f32
      %20 = vector.shape_cast %19 : vector<1x128xi1> to vector<1x128xi1>
      %21 = vector.broadcast %20 : vector<1x128xi1> to vector<8x128xi1>
      %22 = vector.broadcast %cst_10 : f32 to vector<8x128xf32>
      %23 = arith.select %21, %10, %22 : vector<8x128xi1>, vector<8x128xf32>
      %cst_11 = arith.constant dense<0.000000e+00> : vector<8xf32>
      %24 = vector.multi_reduction <add>, %23, %cst_11 [1] : vector<8x128xf32> to vector<8xf32>
      %cst_12 = arith.constant 0.0714285746 : f32
      %25 = vector.broadcast %cst_12 : f32 to vector<8xf32>
      %26 = arith.mulf %24, %25 : vector<8xf32>
      %27 = vector.shape_cast %26 : vector<8xf32> to vector<8x1xf32>
      %28 = vector.broadcast %27 : vector<8x1xf32> to vector<8x128xf32>
      %29 = arith.subf %10, %28 : vector<8x128xf32>
      %cst_13 = arith.constant 0.000000e+00 : f32
      %30 = vector.shape_cast %19 : vector<1x128xi1> to vector<1x128xi1>
      %31 = vector.broadcast %30 : vector<1x128xi1> to vector<8x128xi1>
      %32 = vector.broadcast %cst_13 : f32 to vector<8x128xf32>
      %33 = arith.select %31, %29, %32 : vector<8x128xi1>, vector<8x128xf32>
      %34 = arith.mulf %33, %33 : vector<8x128xf32>
      %cst_14 = arith.constant dense<0.000000e+00> : vector<8xf32>
      %35 = vector.multi_reduction <add>, %34, %cst_14 [1] : vector<8x128xf32> to vector<8xf32>
      %36 = vector.shape_cast %24 : vector<8xf32> to vector<1x8xf32>
      %37 = vector.shape_cast %35 : vector<8xf32> to vector<1x8xf32>
      %38 = tpu.concatenate %36, %37 in 0 : vector<1x8xf32>, vector<1x8xf32> -> vector<2x8xf32>
      %c0_15 = arith.constant 0 : index
      %c0_16 = arith.constant 0 : index
      %c0_17 = arith.constant 0 : index
      %c0_18 = arith.constant 0 : index
      %39 = vector.load %arg6[%c0_15, %c0_16, %c0_17, %c0_18] : memref<1x1x2x8xf32, #tpu.memory_space<vmem>>, vector<1x1x2x8xf32>
      %40 = vector.shape_cast %39 : vector<1x1x2x8xf32> to vector<2x8xf32>
      %41 = vector.shape_cast %38 : vector<2x8xf32> to vector<1x1x2x8xf32>
      tpu.vector_store %arg6[%c0_15, %c0_16, %c0_17, %c0_18], %41 {strides = array<i32>} : memref<1x1x2x8xf32, #tpu.memory_space<vmem>>, vector<1x1x2x8xf32>,
    } else {
    }
    %true = arith.constant true
    %15 = arith.xori %11, %true : i1
    %16 = arith.extui %15 : i1 to i32
    %c0_i32_9 = arith.constant 0 : i32
    %17 = arith.cmpi ne, %16, %c0_i32_9 : i32
    scf.if %17 {
      %cst_10 = arith.constant dense<0.000000e+00> : vector<8xf32>
      %18 = vector.multi_reduction <add>, %10, %cst_10 [1] : vector<8x128xf32> to vector<8xf32>
      %cst_11 = arith.constant 7.812500e-03 : f32
      %19 = vector.broadcast %cst_11 : f32 to vector<8xf32>
      %20 = arith.mulf %18, %19 : vector<8xf32>
      %21 = vector.shape_cast %20 : vector<8xf32> to vector<8x1xf32>
      %22 = vector.broadcast %21 : vector<8x1xf32> to vector<8x128xf32>
      %23 = arith.subf %10, %22 : vector<8x128xf32>
      %24 = arith.mulf %23, %23 : vector<8x128xf32>
      %cst_12 = arith.constant dense<0.000000e+00> : vector<8xf32>
      %25 = vector.multi_reduction <add>, %24, %cst_12 [1] : vector<8x128xf32> to vector<8xf32>
      %26 = vector.shape_cast %18 : vector<8xf32> to vector<1x8xf32>
      %27 = vector.shape_cast %25 : vector<8xf32> to vector<1x8xf32>
      %28 = tpu.concatenate %26, %27 in 0 : vector<1x8xf32>, vector<1x8xf32> -> vector<2x8xf32>
      %c0_13 = arith.constant 0 : index
      %c0_14 = arith.constant 0 : index
      %c0_15 = arith.constant 0 : index
      %c0_16 = arith.constant 0 : index
      %29 = vector.load %arg6[%c0_13, %c0_14, %c0_15, %c0_16] : memref<1x1x2x8xf32, #tpu.memory_space<vmem>>, vector<1x1x2x8xf32>
      %30 = vector.shape_cast %29 : vector<1x1x2x8xf32> to vector<2x8xf32>
      %31 = vector.shape_cast %28 : vector<2x8xf32> to vector<1x1x2x8xf32>
      tpu.vector_store %arg6[%c0_13, %c0_14, %c0_15, %c0_16], %31 {strides = array<i32>} : memref<1x1x2x8xf32, #tpu.memory_space<vmem>>, vector<1x1x2x8xf32>,
    } else {
    }
    return
  }
  func.func @transform_0(%arg0: i32, %arg1: i32, %arg2: i32) -> (i32, i32, i32) {
    %c0_i32 = arith.constant 0 : i32
    %c0_i32_0 = arith.constant 0 : i32
    return %arg0, %c0_i32, %arg1 : i32, i32, i32
  }
  func.func @transform_1(%arg0: i32, %arg1: i32, %arg2: i32) -> (i32, i32, i32, i32) {
    %c0_i32 = arith.constant 0 : i32
    %c0_i32_0 = arith.constant 0 : i32
    %c0_i32_1 = arith.constant 0 : i32
    return %arg1, %arg0, %c0_i32, %c0_i32_0 : i32, i32, i32, i32
  }
  func.func @transform_2(%arg0: i32, %arg1: i32, %arg2: i32) -> (i32, i32) {
    %c0_i32 = arith.constant 0 : i32
    %c0_i32_0 = arith.constant 0 : i32
    return %arg2, %c0_i32 : i32, i32
  }
  func.func @transform_3(%arg0: i32, %arg1: i32, %arg2: i32) -> (i32, i32, i32, i32) {
    %c0_i32 = arith.constant 0 : i32
    %c0_i32_0 = arith.constant 0 : i32
    return %arg0, %arg1, %c0_i32, %arg2 : i32, i32, i32, i32
  }
}

</mosaic_0001>

<bundles_post_ra>
// kernel: tpu_custom_call.1
= control target key start
LH: loop header
LB: loop body
LE: loop exit
PB: predicated region body
PF: predicated region fallthrough
CT: control target
= control target key end

     0   :  { %8 = vsyncpa [#allocation3], 0  ;;  %s977_s0 = inlined_call_operand.hbm [shape: f32[2,8,130], index: 0, kind: input, shape index: {}]   ;;  %s978_s1 = inlined_call_operand.vmem [shape: f32[1,2,8,2], index: 1, kind: input, shape index: {}]   ;;  %s979_s2 = inlined_call_operand.vmem [shape: f32[8,24], index: 2, kind: input, shape index: {}]   ;;  %s980_s3 = inlined_call_operand.hbm [shape: f32[2,1,2,8], index: 3, kind: output, shape index: {}]  }
   0x1   :  { %10 = vsyncpa [#allocation3 + $0x1], 0 }
   0x2   :  { %11 = vsyncpa [#allocation4], 0 }
   0x3   :  { %13 = vsyncpa [#allocation4 + $0x1], 0  ;;  %s796_s12 = smov 0   ;;  %s798_s13 = smov 0  }
   0x4   :  { %s800_s14 = smov 0   ;;  %s802_s15 = smov 0  }
   0x5   :  { %s804_s16 = smov 0   ;;  %s806_s17 = smov 0  }
   0x6 LB: > { %s549_s18 = sadd.s32 4294967295, %s767_s17   ;;  %s550_s19 = sadd.s32 4294967294, %s767_s17   ;;  %s767_s17 = sphi %s806_s17, %s19_s17   ;;  %s763_s16 = sphi %s804_s16, %s996_s16   ;;  %s759_s15 = sphi %s802_s15, %s995_s15   ;;  %s755_s14 = sphi %s800_s14, %s994_s14   ;;  %s751_s13 = sphi %s798_s13, %s993_s13   ;;  %s747_s12 = sphi %s796_s12, %s992_s12  }
   0x7   : > { %s38_s20 = sadd.s32 1, %s763_s16  ;;  %s47_s21 = sadd.s32 1, %s755_s14 }
   0x8   : > { %p40_p0 = scmp.ge.s32.totalorder %s38_s20, 2  ;;  %p54_p1 = scmp.ne.s32.totalorder %s755_s14, %s751_s13 }
   0x9   : > { %p55_p2 = scmp.eq.s32.totalorder %s767_s17, 0  ;;  %p60_p3 = scmp.ne.s32.totalorder %s751_s13, %s747_s12 }
   0xa   : > { %s998_s20 = smov (%p40_p0, %s38_s20), 0  ;;  %p61_p5 = scmp.eq.s32.totalorder %s549_s18, 0 }
   0xb   : > { %p837_p4 = por %p55_p2, %p54_p1  ;;  %s42_s23 = ssub.s32 %s763_s16, %s998_s20 }
   0xc   : > { %p142_p6 = scmp.eq.s32.totalorder %s549_s18, 1  ;;  %p45_p7 = scmp.eq.s32.totalorder %s42_s23, 0 }
   0xd   : > { %p843_p8 = por %p61_p5, %p60_p3  ;;  %p148_p10 = scmp.eq.s32.totalorder %s550_s19, 1 }
   0xe   : > { %p847_p9 = por %p142_p6, %p54_p1  ;;  %p595_p13 = scmp.lt.s32.totalorder %s767_s17, 2 }
   0xf   : > { %s852_s26 = scalar_select %p45_p7, %s755_s14, %s47_s21  }
  0x10   : > { %s984_s25 = scalar_select %p847_p9, 1, 0 }
  0x11   : > { %p854_p11 = por %p148_p10, %p60_p3  ;;  %s175_s28 = sand.u32 1, %s755_s14  }
  0x12   : > { %s554_s29 = sshll.u32 %s175_s28, 3  ;;  %s566_s30 = sshll.u32 %s763_s16, 8 }
  0x13   : > { %s985_s27 = scalar_select %p854_p11, 1, 0 }
  0x14   : > { %s865_s6 = scalar_lea.hbm %s977_s0, %s566_s30  ;;  %s179_s7 = scalar_lea.vmem [#allocation2], %s554_s29 }
  0x15   : > { %s188_s8 = sshll.u32 %s179_s7, 4  ;;  %p871_p0 = pnand %p595_p13, %p837_p4  ;;  %s867_s8 = int_to_ptr.vmem [resolvable:$true] %s188_s8 }
  0x16   : > { %s176_s10 = scalar_lea.sflag [#allocation3], %s175_s28  ;;  %s655_s11 = scalar_lea.hbm %s865_s6, 128 }
  0x17   : > { %p656_p3 = scmp.ne.s32.totalorder %s865_s6, %s655_s11  ;;  %p657_p5 = pneg %p871_p0 }
  0x18   : > { %s660_s21 = scalar_lea.hbm %s977_s0, 512  ;;  %p661_p4 = scmp.lt.u32.totalorder %s865_s6, %s977_s0 }
  0x19   : > { %p658_p6 = pnand %p657_p5, %p656_p3  ;;  %p662_p10 = scmp.lt.u32.totalorder %s660_s21, %s655_s11 }
  0x1a   : > { %p664_p12 = scmp.lt.u32.totalorder %s655_s11, %s865_s6 }
  0x1b   : > { %p659_p7 = pneg %p658_p6  ;;  %p663_p13 = por %p662_p10, %p661_p4 }
  0x1d   : > { %p665_p1 = por %p664_p12, %p663_p13 }
  0x1f   : > { %p666_p2 = pnand %p665_p1, %p659_p7 }
  0x21   : > { %669 = shalt.err (!%p666_p2)
}
  0x22   : > { %s670_s28 = scalar_lea.vmem %s867_s8, 128  ;;  %s769_s29 = smov [#allocation2]  }
  0x23   : > { %p671_p3 = scmp.ne.s32.totalorder %s867_s8, %s670_s28  ;;  %s675_s30 = sshll.u32 %s769_s29, 4  ;;  %s676_s30 = int_to_ptr.vmem [resolvable:$false] %s675_s30 }
  0x24   : > { %s677_s4 = scalar_lea.vmem %s676_s30, 256  ;;  %p678_p9 = scmp.lt.s32.totalorder %s867_s8, %s676_s30 }
  0x25   : > { %p673_p6 = pnand %p671_p3, %p657_p5  ;;  %p679_p4 = scmp.lt.s32.totalorder %s677_s4, %s670_s28 }
  0x27   : > { %p674_p11 = pneg %p673_p6  ;;  %p680_p10 = por %p679_p4, %p678_p9 }
  0x29   : > { %p681_p12 = pnand %p680_p10, %p674_p11 }
  0x2b   : > { %684 = shalt.err (!%p681_p12)
}
  0x2c   : > { %590 = dma.hbm_to_vmem [thread:$0]  (!%p871_p0), %s865_s6, 128, %s867_s8, %s176_s10  }
  0x2d   : > { %p987_p1 = scmp.lt.s32.totalorder %s767_s17, 3  ;;  %p988_p2 = scmp.ge.s32.totalorder %s767_s17, 1 }
  0x2f   : > { %p205_p5 = pnand %p988_p2, %p987_p1 }
  0x30   : > { %s907_s5 = sand.u32 (!%p205_p5), 1, %s751_s13  }
  0x31   : > { %208 = sbr.rel (%p205_p5) target bundleno = 712 (0x2c8), region = 32  ;;  %s558_s7 = sshll.u32 (!%p205_p5), %s907_s5, 3 }
  0x32   : > { %s211_s11 = scalar_lea.sflag (!%p205_p5), [#allocation3], %s907_s5  ;;  %s214_s18 = scalar_lea.vmem (!%p205_p5), [#allocation2], %s558_s7 }
  0x38   : > { %738 = dma.done.wait (%p843_p8), %s211_s11, 128  }
  0x39   : > { %740 = vsyncadd (%p843_p8), %s211_s11, 4294967168  ;;  %p251_p9 = scmp.lt.s32.totalorder %s759_s15, 1  ;;  %v770_v0 = vmov 0.0|0.0   ;;  %vm771_vm0 = vmmov 0   ;;  %v772_v1 = vmov 0.0   ;;  %v261_v2 = vld [vmem:[%s214_s18] sm:$0xff]  ;;  %v355_v14 = vlaneseq }
  0x3a   : > { %580 = vmatprep.subr.bf16.mxu0 %v770_v0  ;;  %577 = vmatprep.mubr.msk.f32.mxu0 %vm771_vm0, %v772_v1  ;;  %s773_s21 = smov 126   ;;  %s774_s24 = smov 127   ;;  %vm270_vm1 = vcmask 1039360   ;;  %vm277_vm2 = vcmask 1031168   ;;  %v262_v13 = vld [vmem:[%s979_s2] sm:$0xff]  ;;  %vm280_vm3 = vcmask 195584  }
  0x3b   : > { %s252_s6 = scalar_select %p251_p9, %s759_s15, 1  ;;  %v356_v15 = vand.u32 127, %v355_v14  ;;  %v374_v16 = vshrl.u32 %v355_v14, 7  ;;  %vm384_vm5 = vcmask 1040384   ;;  %vm386_vm6 = vcmask 58368  }
  0x3c   : > { %s559_s28 = sshll.u32 %s907_s5, 1  ;;  %s563_s29 = sshll.u32 %s759_s15, 5 }
  0x3d   : > { %s560_s8 = sshll.u32 %s252_s6, 3  ;;  %v375_v17 = vsub.s32 %v356_v15, %v374_v16  ;;  %vm360_vm4 = vcmp.lt.s32.totalorder %v356_v15, 14  ;;  %s248_s30 = scalar_lea.vmem [#allocation5], %s559_s28 }
  0x3e   : > { %s256_s19 = scalar_lea.vmem %s978_s1, %s560_s8  ;;  %s431_s4 = sshll.u32 %s248_s30, 4  ;;  %s930_s4 = int_to_ptr.vmem [resolvable:$true] %s431_s4 }
  0x3f   : > { %v263_v3 = vld [vmem:[%s256_s19] sm:$0xff]  ;;  %s928_s18 = scalar_lea.hbm %s980_s3, %s563_s29  ;;  %s416_s6 = scalar_lea.sflag [#allocation4], %s907_s5 }
  0x40   : > { %v650_v4 = vpack.i.bf16 %v263_v3, %v261_v2  ;;  %275 = vrot.lane.b32.xlu1 %v263_v3, %s773_s21  ;;  %s685_s15 = scalar_lea.vmem %s930_s4, 32  ;;  %p989_p11 = scmp.ne.s32.totalorder %s984_s25, 0 }
  0x41   : > { %p686_p8 = scmp.ne.s32.totalorder %s930_s4, %s685_s15  ;;  %s775_s8 = smov [#allocation5]  }
  0x42   : > { %651 = vrot.lane.b32.xlu0 %v650_v4, %s774_s24  ;;  %s689_s9 = sshll.u32 %s775_s8, 4  ;;  %s690_s9 = int_to_ptr.vmem [resolvable:$false] %s689_s9 }
  0x43   : > { %p687_p0 = pnand %p686_p8, %p989_p11  ;;  %s691_s10 = scalar_lea.vmem %s690_s9, 64 }
  0x44   : > { %p692_p13 = scmp.lt.s32.totalorder %s930_s4, %s690_s9  ;;  %p693_p3 = scmp.lt.s32.totalorder %s691_s10, %s685_s15 }
  0x45   : > { %p688_p7 = pneg %p687_p0 }
  0x46   : > { %273 = vrot.lane.b32.xlu0 %v261_v2, %s773_s21  ;;  %p694_p6 = por %p693_p3, %p692_p13 }
  0x48   : > { %p695_p4 = pnand %p694_p6, %p688_p7 }
  0xb2   : > { %v276_v10 = vpop.permute.xlu1 %275 }
  0xb4   : > { %v652_v5 = vpop.permute.xlu0 %651 }
  0xb5   : > { %v654_v6 = vunpack.i.h.bf16 %v652_v5  ;;  %v653_v7 = vunpack.i.l.bf16 %v652_v5 }
  0xb7   : > { %v271_v8 = vsel %vm270_vm1, %v653_v7, %v654_v6 }
  0xb8   : > { %v581_v9 = vpack.c.bf16 %v271_v8, %v261_v2  ;;  %v274_v11 = vpop.permute.xlu0 %273 }
  0xb9   : > { %v278_v12 = vsel %vm277_vm2, %v274_v11, %v276_v10 }
  0xba   : > { %582 = vmatpush3.bf16.msra.mxu0 %v581_v9 }
  0xbb   : > { %575 = vmatprep.subr.mxu0 %v772_v1 }
  0xbe   : > { %576 = vmatpush3.msra.mxu0 %v278_v12 }
  0xbf   : > { %578 = vmatmul.mubr.msk.f32.vlgmr.msra.gmra.mrb[0].mxu0 %vm280_vm3, %v262_v13 }
 0x192   : > { %v350_v18 = vpop.f32.mrb[0].mxu0 }
 0x193   : > { %v579_v19 = vpop.f32.mrb[1].mxu0  ;;  %v363_v20 = vsel %vm360_vm4, %v350_v18, 0.0 }
 0x194   : > { %364 = vadd.xlane.f32.xlu1 %v363_v20 }
 0x221   : > { %v365_v21 = vpop.xlane.xlu1 %364 }
 0x222   : > { %v366_v22 = vmul.f32 0.071428575, %v365_v21  ;;  %v376_v23 = vrot.slane %v365_v21, %v375_v17 }
 0x224   : > { %v367_v24 = vsub.f32 %v350_v18, %v366_v22 }
 0x226   : > { %v368_v25 = vsel %vm360_vm4, %v367_v24, 0.0 }
 0x227   : > { %v369_v26 = vmul.f32 %v368_v25, %v368_v25 }
 0x229   : > { %370 = vadd.xlane.f32.xlu0 %v369_v26 }
 0x2b6   : > { %v371_v27 = vpop.xlane.xlu0 %370 }
 0x2b7   : > { %v382_v28 = vrot.slane %v371_v27, %v375_v17 }
 0x2b9   : > { %v385_v29 = vsel %vm384_vm5, %v376_v23, %v382_v28 }
 0x2ba   : > { %387 = vst.msk [vmem:[%s248_s30] sm:$0x3] %vm386_vm6, %v385_v29 }
 0x2bb   : > { %698 = shalt.err (!%p695_p4)
}
 0x2bc   : > { %s699_s5 = scalar_lea.hbm %s928_s18, 32  ;;  %s703_s24 = scalar_lea.hbm %s980_s3, 64 }
 0x2bd   : > { %p700_p10 = scmp.ne.s32.totalorder %s928_s18, %s699_s5  ;;  %p704_p2 = scmp.lt.u32.totalorder %s928_s18, %s980_s3 }
 0x2be   : > { %p705_p5 = scmp.lt.u32.totalorder %s703_s24, %s699_s5  ;;  %p707_p8 = scmp.lt.u32.totalorder %s699_s5, %s928_s18 }
 0x2bf   : > { %p701_p12 = pnand %p700_p10, %p989_p11 }
 0x2c0   : > { %p706_p9 = por %p705_p5, %p704_p2 }
 0x2c1   : > { %p702_p1 = pneg %p701_p12 }
 0x2c2   : > { %p708_p0 = por %p707_p8, %p706_p9 }
 0x2c4   : > { %p709_p7 = pnand %p708_p0, %p702_p1 }
 0x2c6   : > { %712 = shalt.err (!%p709_p7)
}
 0x2c7   : > { %585 = dma.vmem_to_hbm [thread:$0]  (%p989_p11), %s930_s4, 32, %s928_s18, %s416_s6  }
 0x2c8 PF: > { %s443_s28 = sand.u32 1, %s747_s12   ;;  %p990_p13 = scmp.ne.s32.totalorder %s985_s27, 0 }
 0x2c9   : > { %p991_p3 = scmp.ge.s32.totalorder %s767_s17, 2  ;;  %s444_s29 = scalar_lea.sflag [#allocation4], %s443_s28 }
 0x2cb   : > { %p592_p6 = pnand %p991_p3, %p990_p13 }
 0x2cd   : > { %742 = dma.done.wait (!%p592_p6), %s444_s29, 32  }
 0x2ce   : > { %744 = vsyncadd (!%p592_p6), %s444_s29, 4294967264  ;;  %s19_s17 = sadd.s32 1, %s767_s17   ;;  %s992_s12 = smov %s751_s13 }
 0x2cf   : > { %p16_p4 = scmp.ge.s32.totalorder %s19_s17, 4   ;;  %s993_s13 = smov %s755_s14 }
 0x2d0   : > { %s994_s14 = smov %s852_s26  ;;  %s995_s15 = smov %s763_s16 }
 0x2d1   : > { %s996_s16 = smov %s998_s20  ;;  %18 = sbr.rel (!%p16_p4) target bundleno = 6 (0x6), region = 91 }
 0x2d8   :  { %449 = vsyncpa [#allocation3], 1 }
 0x2d9   :  { %451 = vsyncpa [#allocation3 + $0x1], 1 }
 0x2da   :  { %452 = vsyncpa [#allocation4], 1 }
 0x2db   :  { %454 = vsyncpa [#allocation4 + $0x1], 1 }

</bundles_post_ra>
